<compile_context>
chip_gen: v7x
topology: tpu7x:2x2x1
jax: 0.10.0
libtpu: 0.0.40
codegen_flags: <defaults>
</compile_context>

<pallas_src>
import functools
import math

import jax
import jax.numpy as jnp
from jax.experimental import pallas as pl
from jax.experimental.pallas import tpu as pltpu


def _vmem_budget():
    """Generation-aware scoped-VMEM limit and per-step tile budget."""
    cap = None
    try:
        cap = getattr(pltpu.get_tpu_info(), "vmem_capacity_bytes", None)
    except Exception:
        cap = None
    if not cap:
        cap = 64 * 1024 * 1024          # conservative default (v7x per-core VMEM)
    limit = int(cap * 0.75)             # scoped limit handed to Mosaic
    budget = int(cap * 0.45)            # target for the double-buffered working set
    return limit, budget


def _plan(b, cin, cout, t, tile_t, budget):
    """Pick (rows per step G, time tile tt, num time tiles nt, needs_mask)."""
    # Per batch-row, per time-column VMEM bytes: x tile (f32, double-buffered) +
    # norm_att/cla output tiles (f32, double-buffered) + elementwise intermediates.
    col_bytes = 8 * cin + 40 * cout
    tt_cap = max(128, budget // col_bytes) if tile_t is None else max(1, tile_t)
    if t <= tt_cap:
        # Single time tile: no second pass, no mask.  Pack batch rows per step to
        # amortize per-step overhead, keeping >= 2 batch steps when B >= 2 (megacore).
        row_bytes = max(1, col_bytes * t)
        g_budget = max(1, budget // row_bytes)
        g_cap = max(1, b // 2) if b >= 2 else 1
        g_max = max(1, min(b, g_budget, g_cap))
        g = 1
        for d in range(g_max, 0, -1):
            if b % d == 0:
                g = d
                break
        return g, t, 1, False
    tt = max(128, (tt_cap // 128) * 128)        # lane-aligned streaming tiles
    nt = -(-t // tt)
    return 1, tt, nt, (nt * tt != t)


def _att_pool_kernel(x_ref, w_ref, b_ref,
                     natt_ref, cla_ref, pooled_ref, lse_ref,
                     l_sc, acc_sc,
                     *, rows, cout, tile_t, t_valid, needs_mask, single_tile, activation):
    ti = pl.program_id(1)
    last = pl.num_programs(1) - 1

    @pl.when(ti == 0)
    def _init():
        l_sc[...] = jnp.zeros_like(l_sc)
        acc_sc[...] = jnp.zeros_like(acc_sc)

    for g in range(rows):                                        # static, unrolled
        # One fused MXU call per row for both 1x1-conv projections (bf16 in, f32 acc).
        x_g = x_ref[g].astype(jnp.bfloat16)                      # (Cin, tt)
        z = jnp.dot(w_ref[...], x_g, preferred_element_type=jnp.float32) + b_ref[...]
        t = jnp.tanh(z[:cout])                                   # attention logits in [-1, 1]
        cl = z[cout:]
        if activation == 'sigmoid':
            cl = jax.nn.sigmoid(cl)
        cla_ref[g] = cl.astype(cla_ref.dtype)

        # Constant-shift softmax: |t| <= 1 so exp(t - 1) never overflows and the running
        # max / alpha rescales of a classic online softmax are unnecessary.
        p = jnp.exp(t - 1.0)

        if needs_mask:
            # Multi-tile only (G == 1). Only the ragged last tile pays for the mask; its
            # padded columns hold unspecified data (partial block read), so both p and cl
            # are zeroed there before touching the accumulators.
            @pl.when(ti == last)
            def _stats_masked():
                col = ti * tile_t + jax.lax.broadcasted_iota(jnp.int32, p.shape, 1)
                valid = col < t_valid
                pm = jnp.where(valid, p, 0.0)
                clm = jnp.where(valid, cl, 0.0)
                l_sc[g] += jnp.sum(pm, axis=-1, keepdims=True)
                acc_sc[g] += jnp.sum(pm * clm, axis=-1, keepdims=True)

            @pl.when(ti != last)
            def _stats_plain():
                l_sc[g] += jnp.sum(p, axis=-1, keepdims=True)
                acc_sc[g] += jnp.sum(p * cl, axis=-1, keepdims=True)
        else:
            l_g = jnp.sum(p, axis=-1, keepdims=True)
            l_sc[g] += l_g
            acc_sc[g] += jnp.sum(p * cl, axis=-1, keepdims=True)

        if single_tile:
            # Whole T in one tile: emit normalized attention directly (exact per-row divide).
            natt_ref[g] = (p * (1.0 / l_g)).astype(natt_ref.dtype)
        else:
            # Stash tanh(att); the cheap second pass turns it into softmax via the lse.
            natt_ref[g] = t.astype(natt_ref.dtype)

    @pl.when(ti == last)
    def _finalize():
        for g in range(rows):
            l = l_sc[g]                                          # (Cout, 1)
            lse_ref[g] = 1.0 + jnp.log(l)
            pooled = acc_sc[g] / l                               # exact, once per row
            pooled_ref[g, 0, :] = pooled[:, 0]                   # lane-dense (Cout,) row


def _softmax_finalize_kernel(t_ref, lse_ref, natt_ref):
    # softmax(tanh(att)) = exp(t - logsumexp(t)); fully parallel, division-free.
    natt_ref[0] = jnp.exp(t_ref[0] - lse_ref[0]).astype(natt_ref.dtype)


@functools.partial(jax.jit, static_argnames=("activation", "tile_t"))
def att_block_v2(x, w_att, b_att, w_cla, b_cla, *, activation='linear', tile_t=None):
    """AttBlockV2.forward. x: (B, Cin, T) -> (pooled (B,Cout), norm_att (B,Cout,T), cla (B,Cout,T))."""
    if activation not in ('linear', 'sigmoid'):
        raise ValueError(f"unsupported activation: {activation}")
    B, Cin, T = x.shape
    Cout = w_att.shape[0]

    vmem_limit, budget = _vmem_budget()
    G, tt, nt, needs_mask = _plan(B, Cin, Cout, T, tile_t, budget)
    single_tile = nt == 1
    assert not (single_tile and needs_mask)
    assert B % G == 0

    # Fused projection weight: one MXU call per (row, tile); stays resident in VMEM.
    w_cat = jnp.concatenate([w_att, w_cla], axis=0).astype(jnp.bfloat16)   # (2*Cout, Cin)
    b_cat = jnp.concatenate([b_att, b_cla]).reshape(2 * Cout, 1).astype(jnp.float32)

    kernel = functools.partial(
        _att_pool_kernel, rows=G, cout=Cout, tile_t=tt, t_valid=T,
        needs_mask=needs_mask, single_tile=single_tile, activation=activation)

    buf, cla, pooled3, lse = pl.pallas_call(
        kernel,
        out_shape=(
            jax.ShapeDtypeStruct((B, Cout, T), jnp.float32),   # norm_att (single tile) / tanh(att) (multi)
            jax.ShapeDtypeStruct((B, Cout, T), jnp.float32),   # cla
            jax.ShapeDtypeStruct((B, 1, Cout), jnp.float32),   # pooled, lane-dense last dim
            jax.ShapeDtypeStruct((B, Cout, 1), jnp.float32),   # per-row logsumexp
        ),
        grid_spec=pltpu.PrefetchScalarGridSpec(
            num_scalar_prefetch=0,
            grid=(B // G, nt),                                 # reduction (time) axis last
            in_specs=[
                pl.BlockSpec((G, Cin, tt), lambda b, t: (b, 0, t)),       # x tile (f32 in HBM)
                pl.BlockSpec((2 * Cout, Cin), lambda b, t: (0, 0)),       # fused weight (hot)
                pl.BlockSpec((2 * Cout, 1), lambda b, t: (0, 0)),         # fused bias
            ],
            out_specs=[
                pl.BlockSpec((G, Cout, tt), lambda b, t: (b, 0, t)),
                pl.BlockSpec((G, Cout, tt), lambda b, t: (b, 0, t)),
                pl.BlockSpec((G, 1, Cout), lambda b, t: (b, 0, 0)),
                pl.BlockSpec((G, Cout, 1), lambda b, t: (b, 0, 0)),
            ],
            scratch_shapes=[pltpu.VMEM((G, Cout, 1), jnp.float32)] * 2,   # running sum, pooled acc
        ),
        compiler_params=pltpu.CompilerParams(
            dimension_semantics=("parallel", "arbitrary"),
            vmem_limit_bytes=vmem_limit),
    )(x, w_cat, b_cat)

    if single_tile:
        norm_att = buf
    else:
        # Cheap fully parallel second pass: norm_att = exp(tanh_att - lse), written in
        # place over the tanh buffer (aliased -> no extra HBM allocation).
        norm_att = pl.pallas_call(
            _softmax_finalize_kernel,
            out_shape=jax.ShapeDtypeStruct((B, Cout, T), jnp.float32),
            grid_spec=pltpu.PrefetchScalarGridSpec(
                num_scalar_prefetch=0,
                grid=(B, nt),
                in_specs=[
                    pl.BlockSpec((1, Cout, tt), lambda b, t: (b, 0, t)),
                    pl.BlockSpec((1, Cout, 1), lambda b, t: (b, 0, 0)),
                ],
                out_specs=pl.BlockSpec((1, Cout, tt), lambda b, t: (b, 0, t)),
            ),
            compiler_params=pltpu.CompilerParams(
                dimension_semantics=("parallel", "parallel"),
                vmem_limit_bytes=vmem_limit),
            input_output_aliases={0: 0},
        )(buf, lse)

    pooled = jnp.squeeze(pooled3, axis=1)                       # (B, Cout)
    return pooled, norm_att, cla


def _xavier_uniform(key, out_features, in_features):
    # Matches nn.init.xavier_uniform_ on a Conv1d weight (out, in, k=1).
    bound = math.sqrt(6.0 / (in_features + out_features))
    return jax.random.uniform(key, (out_features, in_features), jnp.float32, -bound, bound)


def _reference(x, w_att, b_att, w_cla, b_cla, activation):
    # Pure-JAX reference of AttBlockV2.forward.
    att = jnp.einsum('oi,bit->bot', w_att, x, precision='highest') + b_att[None, :, None]
    norm_att = jax.nn.softmax(jnp.tanh(att), axis=-1)
    cla = jnp.einsum('oi,bit->bot', w_cla, x, precision='highest') + b_cla[None, :, None]
    if activation == 'sigmoid':
        cla = jax.nn.sigmoid(cla)
    return jnp.sum(norm_att * cla, axis=2), norm_att, cla


if __name__ == "__main__":
    key = jax.random.PRNGKey(0)
    kx, ka, kc, kba, kbc = jax.random.split(key, 5)

    B, Cin, Cout = 4, 128, 8
    w_att = _xavier_uniform(ka, Cout, Cin)
    w_cla = _xavier_uniform(kc, Cout, Cin)
    b_att = 0.1 * jax.random.normal(kba, (Cout,), jnp.float32)
    b_cla = 0.1 * jax.random.normal(kbc, (Cout,), jnp.float32)

    configs = [
        (384, 'linear', 128),     # multi-tile, T divisible by the tile
        (200, 'sigmoid', 128),    # multi-tile, ragged (masked) last tile, no pad copy
        (96, 'linear', None),     # single-tile fast path, batch rows packed per step
        (640, 'sigmoid', None),   # single-tile auto tiling, sigmoid head
    ]

    ok = True
    for T, activation, tile_t in configs:
        x = jax.random.normal(jax.random.fold_in(kx, T), (B, Cin, T), jnp.float32)
        pooled, norm_att, cla = att_block_v2(x, w_att, b_att, w_cla, b_cla,
                                             activation=activation, tile_t=tile_t)
        jax.block_until_ready((pooled, norm_att, cla))

        # The kernel quantizes x / the fused weight to bf16 for the MXU (bf16 products
        # are exact in f32); compare against a reference on the same quantized inputs.
        xq = x.astype(jnp.bfloat16).astype(jnp.float32)
        waq = w_att.astype(jnp.bfloat16).astype(jnp.float32)
        wcq = w_cla.astype(jnp.bfloat16).astype(jnp.float32)
        r_pooled, r_natt, r_cla = _reference(xq, waq, b_att, wcq, b_cla, activation)

        ok &= pooled.shape == (B, Cout) and norm_att.shape == (B, Cout, T) and cla.shape == (B, Cout, T)
        ok &= bool(jnp.allclose(cla, r_cla, atol=1e-4, rtol=1e-3))
        ok &= bool(jnp.allclose(norm_att, r_natt, atol=1e-5, rtol=1e-3))
        ok &= bool(jnp.allclose(pooled, r_pooled, atol=5e-4, rtol=1e-3))

    print("KERNEL_OK" if ok else "MISMATCH")
</pallas_src>

<mosaic_0001>
module attributes {stable_mosaic.version = 11 : i64} {
  func.func @_softmax_finalize_kernel(%arg0: i32, %arg1: i32, %arg2: memref<1x8x128xf32, #tpu.memory_space<vmem>>, %arg3: memref<1x8x1xf32, #tpu.memory_space<vmem>>, %arg4: memref<1x8x128xf32, #tpu.memory_space<vmem>>) attributes {dimension_semantics = [#tpu.dimension_semantics<parallel>, #tpu.dimension_semantics<parallel>], iteration_bounds = array<i64: 4, 3>, scalar_prefetch = 0 : i64, scratch_operands = 0 : i64, tpu.core_type = #tpu.core_type<tc>, window_params = [{transform_indices = @transform_0, window_bounds = array<i64: 1, 8, 128>}, {transform_indices = @transform_1, window_bounds = array<i64: 1, 8, 1>}, {transform_indices = @transform_2, window_bounds = array<i64: 1, 8, 128>}]} {
    %c0 = arith.constant 0 : index
    %c0_0 = arith.constant 0 : index
    %c0_1 = arith.constant 0 : index
    %0 = vector.load %arg2[%c0, %c0_0, %c0_1] : memref<1x8x128xf32, #tpu.memory_space<vmem>>, vector<1x8x128xf32>
    %1 = vector.shape_cast %0 : vector<1x8x128xf32> to vector<8x128xf32>
    %c0_2 = arith.constant 0 : index
    %c0_3 = arith.constant 0 : index
    %c0_4 = arith.constant 0 : index
    %2 = vector.load %arg3[%c0_2, %c0_3, %c0_4] : memref<1x8x1xf32, #tpu.memory_space<vmem>>, vector<1x8x1xf32>
    %3 = vector.shape_cast %2 : vector<1x8x1xf32> to vector<8x1xf32>
    %4 = vector.broadcast %3 : vector<8x1xf32> to vector<8x128xf32>
    %5 = arith.subf %1, %4 : vector<8x128xf32>
    %6 = math.exp %5 : vector<8x128xf32>
    %c0_5 = arith.constant 0 : index
    %c0_6 = arith.constant 0 : index
    %c0_7 = arith.constant 0 : index
    %7 = vector.load %arg4[%c0_5, %c0_6, %c0_7] : memref<1x8x128xf32, #tpu.memory_space<vmem>>, vector<1x8x128xf32>
    %8 = vector.shape_cast %7 : vector<1x8x128xf32> to vector<8x128xf32>
    %9 = vector.shape_cast %6 : vector<8x128xf32> to vector<1x8x128xf32>
    tpu.vector_store %arg4[%c0_5, %c0_6, %c0_7], %9 {strides = array<i32>} : memref<1x8x128xf32, #tpu.memory_space<vmem>>, vector<1x8x128xf32>,
    return
  }
  func.func @transform_0(%arg0: i32, %arg1: i32) -> (i32, i32, i32) {
    %c0_i32 = arith.constant 0 : i32
    %c0_i32_0 = arith.constant 0 : i32
    return %arg0, %c0_i32, %arg1 : i32, i32, i32
  }
  func.func @transform_1(%arg0: i32, %arg1: i32) -> (i32, i32, i32) {
    %c0_i32 = arith.constant 0 : i32
    %c0_i32_0 = arith.constant 0 : i32
    %c0_i32_1 = arith.constant 0 : i32
    return %arg0, %c0_i32, %c0_i32_0 : i32, i32, i32
  }
  func.func @transform_2(%arg0: i32, %arg1: i32) -> (i32, i32, i32) {
    %c0_i32 = arith.constant 0 : i32
    %c0_i32_0 = arith.constant 0 : i32
    return %arg0, %c0_i32, %arg1 : i32, i32, i32
  }
}

module attributes {stable_mosaic.version = 11 : i64} {
  func.func @_att_pool_kernel(%arg0: i32, %arg1: i32, %arg2: memref<1x128x128xf32, #tpu.memory_space<vmem>>, %arg3: memref<16x128xbf16, #tpu.memory_space<vmem>>, %arg4: memref<16x1xf32, #tpu.memory_space<vmem>>, %arg5: memref<1x8x128xf32, #tpu.memory_space<vmem>>, %arg6: memref<1x8x128xf32, #tpu.memory_space<vmem>>, %arg7: memref<1x1x8xf32, #tpu.memory_space<vmem>>, %arg8: memref<1x8x1xf32, #tpu.memory_space<vmem>>, %arg9: memref<1x8x1xf32, #tpu.memory_space<vmem>>, %arg10: memref<1x8x1xf32, #tpu.memory_space<vmem>>) attributes {dimension_semantics = [#tpu.dimension_semantics<parallel>, #tpu.dimension_semantics<arbitrary>], iteration_bounds = array<i64: 4, 3>, scalar_prefetch = 0 : i64, scratch_operands = 2 : i64, tpu.core_type = #tpu.core_type<tc>, window_params = [{transform_indices = @transform_0, window_bounds = array<i64: 1, 128, 128>}, {pipeline_mode = #tpu.pipeline_mode<synchronous>, transform_indices = @transform_1, window_bounds = array<i64: 16, 128>}, {pipeline_mode = #tpu.pipeline_mode<synchronous>, transform_indices = @transform_2, window_bounds = array<i64: 16, 1>}, {transform_indices = @transform_3, window_bounds = array<i64: 1, 8, 128>}, {transform_indices = @transform_4, window_bounds = array<i64: 1, 8, 128>}, {transform_indices = @transform_5, window_bounds = array<i64: 1, 1, 8>}, {transform_indices = @transform_6, window_bounds = array<i64: 1, 8, 1>}]} {
    %c0_i32 = arith.constant 0 : i32
    %0 = arith.cmpi eq, %arg1, %c0_i32 : i32
    %1 = arith.extui %0 : i1 to i32
    %c0_i32_0 = arith.constant 0 : i32
    %2 = arith.cmpi ne, %1, %c0_i32_0 : i32
    scf.if %2 {
      %cst_29 = arith.constant 0.000000e+00 : f32
      %43 = vector.broadcast %cst_29 : f32 to vector<1x8x1xf32>
      %c0_30 = arith.constant 0 : index
      %c0_31 = arith.constant 0 : index
      %c0_32 = arith.constant 0 : index
      %44 = vector.load %arg9[%c0_30, %c0_31, %c0_32] : memref<1x8x1xf32, #tpu.memory_space<vmem>>, vector<1x8x1xf32>
      tpu.vector_store %arg9[%c0_30, %c0_31, %c0_32], %43 {strides = array<i32>} : memref<1x8x1xf32, #tpu.memory_space<vmem>>, vector<1x8x1xf32>,
      %cst_33 = arith.constant 0.000000e+00 : f32
      %45 = vector.broadcast %cst_33 : f32 to vector<1x8x1xf32>
      %c0_34 = arith.constant 0 : index
      %c0_35 = arith.constant 0 : index
      %c0_36 = arith.constant 0 : index
      %46 = vector.load %arg10[%c0_34, %c0_35, %c0_36] : memref<1x8x1xf32, #tpu.memory_space<vmem>>, vector<1x8x1xf32>
      tpu.vector_store %arg10[%c0_34, %c0_35, %c0_36], %45 {strides = array<i32>} : memref<1x8x1xf32, #tpu.memory_space<vmem>>, vector<1x8x1xf32>,
    } else {
    }
    %c0 = arith.constant 0 : index
    %c0_1 = arith.constant 0 : index
    %c0_2 = arith.constant 0 : index
    %3 = vector.load %arg2[%c0, %c0_1, %c0_2] : memref<1x128x128xf32, #tpu.memory_space<vmem>>, vector<1x128x128xf32>
    %4 = vector.shape_cast %3 : vector<1x128x128xf32> to vector<128x128xf32>
    %5 = arith.truncf %4 : vector<128x128xf32> to vector<128x128xbf16>
    %c0_3 = arith.constant 0 : index
    %c0_4 = arith.constant 0 : index
    %6 = vector.load %arg3[%c0_3, %c0_4] : memref<16x128xbf16, #tpu.memory_space<vmem>>, vector<16x128xbf16>
    %cst = arith.constant dense<0.000000e+00> : vector<16x128xf32>
    %7 = tpu.matmul %6, %5, %cst {dimension_numbers = #tpu.dot_dimension_numbers<[1], [0], [0], [1], [0, 0, 1, 1], [], []>} : vector<16x128xbf16>, vector<128x128xbf16>, vector<16x128xf32> -> vector<16x128xf32>
    %c0_5 = arith.constant 0 : index
    %c0_6 = arith.constant 0 : index
    %8 = vector.load %arg4[%c0_5, %c0_6] : memref<16x1xf32, #tpu.memory_space<vmem>>, vector<16x1xf32>
    %9 = vector.broadcast %8 : vector<16x1xf32> to vector<16x128xf32>
    %10 = arith.addf %7, %9 : vector<16x128xf32>
    %11 = vector.extract_strided_slice %10 {offsets = [0, 0], sizes = [8, 128], strides = [1, 1]} : vector<16x128xf32> to vector<8x128xf32>
    %12 = math.tanh %11 : vector<8x128xf32>
    %13 = vector.extract_strided_slice %10 {offsets = [8, 0], sizes = [8, 128], strides = [1, 1]} : vector<16x128xf32> to vector<8x128xf32>
    %c0_7 = arith.constant 0 : index
    %c0_8 = arith.constant 0 : index
    %c0_9 = arith.constant 0 : index
    %14 = vector.load %arg6[%c0_7, %c0_8, %c0_9] : memref<1x8x128xf32, #tpu.memory_space<vmem>>, vector<1x8x128xf32>
    %15 = vector.shape_cast %14 : vector<1x8x128xf32> to vector<8x128xf32>
    %16 = vector.shape_cast %13 : vector<8x128xf32> to vector<1x8x128xf32>
    tpu.vector_store %arg6[%c0_7, %c0_8, %c0_9], %16 {strides = array<i32>} : memref<1x8x128xf32, #tpu.memory_space<vmem>>, vector<1x8x128xf32>,
    %cst_10 = arith.constant 1.000000e+00 : f32
    %17 = vector.broadcast %cst_10 : f32 to vector<8x128xf32>
    %18 = arith.subf %12, %17 : vector<8x128xf32>
    %19 = math.exp %18 : vector<8x128xf32>
    %cst_11 = arith.constant dense<0.000000e+00> : vector<8xf32>
    %20 = vector.multi_reduction <add>, %19, %cst_11 [1] : vector<8x128xf32> to vector<8xf32>
    %21 = vector.shape_cast %20 : vector<8xf32> to vector<8x1xf32>
    %c0_12 = arith.constant 0 : index
    %c0_13 = arith.constant 0 : index
    %c0_14 = arith.constant 0 : index
    %22 = vector.load %arg9[%c0_12, %c0_13, %c0_14] : memref<1x8x1xf32, #tpu.memory_space<vmem>>, vector<1x8x1xf32>
    %23 = vector.shape_cast %22 : vector<1x8x1xf32> to vector<8x1xf32>
    %24 = arith.addf %23, %21 : vector<8x1xf32>
    %c0_15 = arith.constant 0 : index
    %c0_16 = arith.constant 0 : index
    %c0_17 = arith.constant 0 : index
    %25 = vector.load %arg9[%c0_15, %c0_16, %c0_17] : memref<1x8x1xf32, #tpu.memory_space<vmem>>, vector<1x8x1xf32>
    %26 = vector.shape_cast %25 : vector<1x8x1xf32> to vector<8x1xf32>
    %27 = vector.shape_cast %24 : vector<8x1xf32> to vector<1x8x1xf32>
    tpu.vector_store %arg9[%c0_15, %c0_16, %c0_17], %27 {strides = array<i32>} : memref<1x8x1xf32, #tpu.memory_space<vmem>>, vector<1x8x1xf32>,
    %c0_18 = arith.constant 0 : index
    %c0_19 = arith.constant 0 : index
    %c0_20 = arith.constant 0 : index
    %28 = vector.load %arg10[%c0_18, %c0_19, %c0_20] : memref<1x8x1xf32, #tpu.memory_space<vmem>>, vector<1x8x1xf32>
    %29 = vector.shape_cast %28 : vector<1x8x1xf32> to vector<8x1xf32>
    %30 = arith.mulf %19, %13 : vector<8x128xf32>
    %cst_21 = arith.constant dense<0.000000e+00> : vector<8xf32>
    %31 = vector.multi_reduction <add>, %30, %cst_21 [1] : vector<8x128xf32> to vector<8xf32>
    %32 = vector.shape_cast %31 : vector<8xf32> to vector<8x1xf32>
    %33 = arith.addf %29, %32 : vector<8x1xf32>
    %c0_22 = arith.constant 0 : index
    %c0_23 = arith.constant 0 : index
    %c0_24 = arith.constant 0 : index
    %34 = vector.load %arg10[%c0_22, %c0_23, %c0_24] : memref<1x8x1xf32, #tpu.memory_space<vmem>>, vector<1x8x1xf32>
    %35 = vector.shape_cast %34 : vector<1x8x1xf32> to vector<8x1xf32>
    %36 = vector.shape_cast %33 : vector<8x1xf32> to vector<1x8x1xf32>
    tpu.vector_store %arg10[%c0_22, %c0_23, %c0_24], %36 {strides = array<i32>} : memref<1x8x1xf32, #tpu.memory_space<vmem>>, vector<1x8x1xf32>,
    %c0_25 = arith.constant 0 : index
    %c0_26 = arith.constant 0 : index
    %c0_27 = arith.constant 0 : index
    %37 = vector.load %arg5[%c0_25, %c0_26, %c0_27] : memref<1x8x128xf32, #tpu.memory_space<vmem>>, vector<1x8x128xf32>
    %38 = vector.shape_cast %37 : vector<1x8x128xf32> to vector<8x128xf32>
    %39 = vector.shape_cast %12 : vector<8x128xf32> to vector<1x8x128xf32>
    tpu.vector_store %arg5[%c0_25, %c0_26, %c0_27], %39 {strides = array<i32>} : memref<1x8x128xf32, #tpu.memory_space<vmem>>, vector<1x8x128xf32>,
    %c2_i32 = arith.constant 2 : i32
    %40 = arith.cmpi eq, %arg1, %c2_i32 : i32
    %41 = arith.extui %40 : i1 to i32
    %c0_i32_28 = arith.constant 0 : i32
    %42 = arith.cmpi ne, %41, %c0_i32_28 : i32
    scf.if %42 {
      %c0_29 = arith.constant 0 : index
      %c0_30 = arith.constant 0 : index
      %c0_31 = arith.constant 0 : index
      %43 = vector.load %arg9[%c0_29, %c0_30, %c0_31] : memref<1x8x1xf32, #tpu.memory_space<vmem>>, vector<1x8x1xf32>
      %44 = vector.shape_cast %43 : vector<1x8x1xf32> to vector<8x1xf32>
      %45 = math.log %44 : vector<8x1xf32>
      %cst_32 = arith.constant 1.000000e+00 : f32
      %46 = vector.broadcast %cst_32 : f32 to vector<8x1xf32>
      %47 = arith.addf %46, %45 : vector<8x1xf32>
      %c0_33 = arith.constant 0 : index
      %c0_34 = arith.constant 0 : index
      %c0_35 = arith.constant 0 : index
      %48 = vector.load %arg8[%c0_33, %c0_34, %c0_35] : memref<1x8x1xf32, #tpu.memory_space<vmem>>, vector<1x8x1xf32>
      %49 = vector.shape_cast %48 : vector<1x8x1xf32> to vector<8x1xf32>
      %50 = vector.shape_cast %47 : vector<8x1xf32> to vector<1x8x1xf32>
      tpu.vector_store %arg8[%c0_33, %c0_34, %c0_35], %50 {strides = array<i32>} : memref<1x8x1xf32, #tpu.memory_space<vmem>>, vector<1x8x1xf32>,
      %c0_36 = arith.constant 0 : index
      %c0_37 = arith.constant 0 : index
      %c0_38 = arith.constant 0 : index
      %51 = vector.load %arg10[%c0_36, %c0_37, %c0_38] : memref<1x8x1xf32, #tpu.memory_space<vmem>>, vector<1x8x1xf32>
      %52 = vector.shape_cast %51 : vector<1x8x1xf32> to vector<8x1xf32>
      %53 = arith.divf %52, %44 : vector<8x1xf32>
      %54 = vector.shape_cast %53 : vector<8x1xf32> to vector<8xf32>
      %c0_39 = arith.constant 0 : index
      %c0_40 = arith.constant 0 : index
      %c0_41 = arith.constant 0 : index
      %55 = vector.load %arg7[%c0_39, %c0_40, %c0_41] : memref<1x1x8xf32, #tpu.memory_space<vmem>>, vector<1x1x8xf32>
      %56 = vector.shape_cast %55 : vector<1x1x8xf32> to vector<8xf32>
      %57 = vector.shape_cast %54 : vector<8xf32> to vector<1x1x8xf32>
      tpu.vector_store %arg7[%c0_39, %c0_40, %c0_41], %57 {strides = array<i32>} : memref<1x1x8xf32, #tpu.memory_space<vmem>>, vector<1x1x8xf32>,
    } else {
    }
    return
  }
  func.func @transform_0(%arg0: i32, %arg1: i32) -> (i32, i32, i32) {
    %c0_i32 = arith.constant 0 : i32
    %c0_i32_0 = arith.constant 0 : i32
    return %arg0, %c0_i32, %arg1 : i32, i32, i32
  }
  func.func @transform_1(%arg0: i32, %arg1: i32) -> (i32, i32) {
    %c0_i32 = arith.constant 0 : i32
    %c0_i32_0 = arith.constant 0 : i32
    %c0_i32_1 = arith.constant 0 : i32
    return %c0_i32, %c0_i32_0 : i32, i32
  }
  func.func @transform_2(%arg0: i32, %arg1: i32) -> (i32, i32) {
    %c0_i32 = arith.constant 0 : i32
    %c0_i32_0 = arith.constant 0 : i32
    %c0_i32_1 = arith.constant 0 : i32
    return %c0_i32, %c0_i32_0 : i32, i32
  }
  func.func @transform_3(%arg0: i32, %arg1: i32) -> (i32, i32, i32) {
    %c0_i32 = arith.constant 0 : i32
    %c0_i32_0 = arith.constant 0 : i32
    return %arg0, %c0_i32, %arg1 : i32, i32, i32
  }
  func.func @transform_4(%arg0: i32, %arg1: i32) -> (i32, i32, i32) {
    %c0_i32 = arith.constant 0 : i32
    %c0_i32_0 = arith.constant 0 : i32
    return %arg0, %c0_i32, %arg1 : i32, i32, i32
  }
  func.func @transform_5(%arg0: i32, %arg1: i32) -> (i32, i32, i32) {
    %c0_i32 = arith.constant 0 : i32
    %c0_i32_0 = arith.constant 0 : i32
    %c0_i32_1 = arith.constant 0 : i32
    return %arg0, %c0_i32, %c0_i32_0 : i32, i32, i32
  }
  func.func @transform_6(%arg0: i32, %arg1: i32) -> (i32, i32, i32) {
    %c0_i32 = arith.constant 0 : i32
    %c0_i32_0 = arith.constant 0 : i32
    %c0_i32_1 = arith.constant 0 : i32
    return %arg0, %c0_i32, %c0_i32_0 : i32, i32, i32
  }
}

</mosaic_0001>

<bundles_post_ra>
// kernel: att_block_v2.3
= control target key start
LH: loop header
LB: loop body
LE: loop exit
PB: predicated region body
PF: predicated region fallthrough
CT: control target
= control target key end

     0   :  { %s412_s9 = smov 0   ;;  %s414_s10 = smov 0   ;;  %s466_s0 = inlined_call_operand.vmem [shape: f32[4,8,384], index: 0, kind: input, shape index: {}, may-alias: {0,2}]   ;;  %s467_s1 = inlined_call_operand.vmem [shape: f32[4,8,1], index: 1, kind: input, shape index: {}]   ;;  %s468_s2 = inlined_call_operand.vmem [shape: f32[4,8,384], index: 2, kind: output, shape index: {}, may-alias: {0,2}]  }
   0x1   :  { %s416_s11 = smov 0   ;;  %s418_s12 = smov 0  }
   0x2   :  { %s420_s13 = smov 0  }
   0x3 LB: > { %s21_s14 = sadd.s32 1, %s386_s11  ;;  %s24_s15 = sadd.s32 1, %s390_s12  ;;  %s394_s13 = sphi %s420_s13, %s12_s13   ;;  %s390_s12 = sphi %s418_s12, %s472_s12   ;;  %s386_s11 = sphi %s416_s11, %s471_s11   ;;  %s382_s10 = sphi %s414_s10, %s470_s10   ;;  %s378_s9 = sphi %s412_s9, %s469_s9  }
   0x4   : > { %p22_p0 = scmp.ge.s32.totalorder %s21_s14, 3  ;;  %p305_p1 = scmp.ge.s32.totalorder %s394_s13, 1 }
   0x5   : > { %p140_p2 = scmp.lt.s32.totalorder %s394_s13, 13 }
   0x6   : > { %s474_s14 = smov (%p22_p0, %s21_s14), 0  ;;  %s476_s15 = smov (!%p22_p0, %s24_s15), %s390_s12 }
   0x7   : > { %p141_p3 = pnand %p305_p1, %p140_p2  ;;  %p26_p4 = scmp.ge.s32.totalorder %s476_s15, 4 }
   0x8   : > { %p172_p5 = scmp.lt.s32.totalorder (!%p141_p3), %s382_s10, 3  ;;  %v396_v0 = vmov (!%p141_p3), 0   ;;  %p174_p6 = scmp.lt.s32.totalorder (!%p141_p3), %s378_s9, 2 }
   0x9   : > { %s478_s15 = smov (%p26_p4, %s476_s15), 0  ;;  %144 = sbr.rel (%p141_p3) target bundleno = 164 (0xa4), region = 28 }
   0xa   : > { %353 = vset.pattern.permute.xlu0 (!%p141_p3), %v396_v0 }
  0x10   : > { %s480_s10 = smov (!%p172_p5, %s382_s10), 3  ;;  %s482_s9 = smov (!%p174_p6, %s378_s9), 2 }
  0x11   : > { %s307_s16 = sshll.u32 %s480_s10, 3  ;;  %s311_s20 = smul.u32 3, %s480_s10 }
  0x12   : > { %s183_s19 = scalar_lea.vmem %s467_s1, %s307_s16 }
  0x13   : > { %v193_v1 = vld [vmem:[%s183_s19] sm:$0xff]  ;;  %s177_s21 = sadd.s32 %s311_s20, %s482_s9 }
  0x14   : > { %196 = vperm.xlu0 %353, %v193_v1   ;;  %s306_s22 = sshll.u32 %s177_s21, 3 }
  0x15   : > { %s179_s25 = scalar_lea.vmem %s466_s0, %s306_s22  ;;  %s191_s28 = scalar_lea.vmem %s468_s2, %s306_s22 }
  0x16   : > { %v192_v2 = vld [vmem:[%s179_s25] sm:$0xff] }
  0x93   : > { %v197_v3 = vpop.permute.xlu0 %196 }
  0x94   : > { %v199_v4 = vsub.f32 %v192_v2, %v197_v3 }
  0x96   : > { %v200_v5 = vmul.f32 1.442695, %v199_v4 }
  0x98   : > { %354 = vpow2.f32 %v200_v5 }
  0xa2   : > { %v355_v6 = vpop.eup %354 }
  0xa3   : > { %202 = vst [vmem:[%s191_s28] sm:$0xff] %v355_v6 }
  0xa4 PF: > { %s12_s13 = sadd.s32 1, %s394_s13   ;;  %s469_s9 = smov %s386_s11 }
  0xa5   : > { %p9_p7 = scmp.ge.s32.totalorder %s12_s13, 14   ;;  %s470_s10 = smov %s390_s12 }
  0xa6   : > { %s471_s11 = smov %s474_s14  ;;  %s472_s12 = smov %s478_s15 }
  0xa7   :  { %11 = sbr.rel (!%p9_p7) target bundleno = 3 (0x3), region = 61 }

// kernel: att_block_v2.2
= control target key start
LH: loop header
LB: loop body
LE: loop exit
PB: predicated region body
PF: predicated region fallthrough
CT: control target
= control target key end

     0   :  { %s1426_s0 = inlined_call_operand.hbm [shape: f32[4,128,384], index: 0, kind: input, shape index: {}]   ;;  %s1427_s1 = inlined_call_operand.vmem [shape: bf16[16,128], index: 1, kind: input, shape index: {}]   ;;  %s1428_s2 = inlined_call_operand.vmem [shape: f32[16,1], index: 2, kind: input, shape index: {}]   ;;  %s1429_s3 = inlined_call_operand.vmem [shape: f32[4,8,384], index: 3, kind: output, shape index: {0}]   ;;  %s1430_s4 = inlined_call_operand.hbm [shape: f32[4,8,384], index: 4, kind: output, shape index: {1}]   ;;  %s1431_s5 = inlined_call_operand.hbm [shape: f32[4,1,8], index: 5, kind: output, shape index: {2}]   ;;  %s1432_s6 = inlined_call_operand.vmem [shape: f32[4,8,1], index: 6, kind: output, shape index: {3}]  }
   0x1   :  { %1445 = sst [smem:[#allocation24_spill]] %s1426_s0 }
   0x2   :  { %1446 = sst [smem:[#allocation25_spill]] %s1431_s5 }
   0x3   :  { %12 = vsyncpa [#allocation5], 0 }
   0x4   :  { %14 = vsyncpa [#allocation5 + $0x1], 0 }
   0x5   :  { %15 = vsyncpa [#allocation6], 0 }
   0x6   :  { %17 = vsyncpa [#allocation6 + $0x1], 0 }
   0x7   :  { %18 = vsyncpa [#allocation9], 0 }
   0x8   :  { %20 = vsyncpa [#allocation9 + $0x1], 0  ;;  %s1097_s21 = smov 0   ;;  %s1099_s22 = smov 0  }
   0x9   :  { %s1101_s23 = smov 0   ;;  %s1103_s24 = smov 0  }
   0xa   :  { %s1105_s25 = smov 0   ;;  %s1107_s26 = smov 0  }
   0xb   :  { %s1109_s27 = smov 0   ;;  %s1111_s28 = smov 0  }
   0xc   :  { %s1113_s29 = smov 0   ;;  %s1115_s30 = smov 0  }
   0xd   :  { %s1117_s7 = smov 0  }
   0xe LB: > { %1447 = sst [smem:[#allocation13_spill]] %s1017_s23  ;;  %s687_s8 = sadd.s32 4294967295, %s1049_s7   ;;  %s1049_s7 = sphi %s1117_s7, %s26_s7   ;;  %s1045_s30 = sphi %s1115_s30, %s1482_s30   ;;  %s1041_s29 = sphi %s1113_s29, %s1481_s29   ;;  %s1037_s28 = sphi %s1111_s28, %s1480_s28   ;;  %s1033_s27 = sphi %s1109_s27, %s1479_s27   ;;  %s1029_s26 = sphi %s1107_s26, %s1478_s26   ;;  %s1025_s25 = sphi %s1105_s25, %s1477_s25   ;;  %s1021_s24 = sphi %s1103_s24, %s1476_s24   ;;  %s1017_s23 = sphi %s1101_s23, %s1475_s23   ;;  %s1013_s22 = sphi %s1099_s22, %s1484_s22   ;;  %s1009_s21 = sphi %s1097_s21, %s1483_s21  }
   0xf   : > { %1448 = sst [smem:[#allocation14_spill]] %s1021_s24  ;;  %s688_s9 = sadd.s32 4294967294, %s1049_s7  }
  0x10   : > { %1449 = sst [smem:[#allocation15_spill]] %s1025_s25  ;;  %s35_s10 = sadd.s32 1, %s1041_s29 }
  0x11   : > { %1450 = sst [smem:[#allocation16_spill]] %s1029_s26  ;;  %s38_s11 = sadd.s32 1, %s1045_s30 }
  0x12   : > { %1451 = sst [smem:[#allocation17_spill]] %s1041_s29  ;;  %p36_p0 = scmp.ge.s32.totalorder %s35_s10, 3 }
  0x13   : > { %1452 = sst [smem:[#allocation18_spill]] %s1045_s30  ;;  %s47_s12 = sadd.s32 1, %s1029_s26 }
  0x14   : > { %p54_p1 = scmp.ne.s32.totalorder %s1029_s26, %s1025_s25  ;;  %p55_p2 = scmp.eq.s32.totalorder %s1049_s7, 0 }
  0x15   : > { %s1486_s10 = smov (%p36_p0, %s35_s10), 0  ;;  %s1488_s11 = smov (!%p36_p0, %s38_s11), %s1045_s30 }
  0x16   : > { %1453 = sst [smem:[#allocation19_spill]] %s1486_s10  ;;  %s43_s13 = ssub.s32 %s1041_s29, %s1486_s10 }
  0x17   : > { %p1165_p3 = por %p55_p2, %p54_p1  ;;  %p40_p4 = scmp.ge.s32.totalorder %s1488_s11, 4 }
  0x18   : > { %p60_p5 = scmp.ne.s32.totalorder %s1025_s25, %s1021_s24  ;;  %p61_p6 = scmp.eq.s32.totalorder %s687_s8, 0 }
  0x19   : > { %p1171_p7 = scmp.eq.s32.totalorder %s687_s8, 11  ;;  %s1490_s11 = smov (%p40_p4, %s1488_s11), 0 }
  0x1a   : > { %1456 = sst [smem:[#allocation20_spill]] %s1490_s11  ;;  %p1177_p8 = por %p61_p6, %p60_p5 }
  0x1b   : > { %p1183_p9 = por %p1171_p7, %p54_p1  ;;  %s42_s18 = ssub.s32 %s1045_s30, %s1490_s11 }
  0x1c   : > { %p162_p10 = scmp.eq.s32.totalorder %s688_s9, 11  ;;  %s44_s19 = sor.u32 %s43_s13, %s42_s18 }
  0x1d   : > { %s1458_s17 = scalar_select %p1183_p9, 1, 0 }
  0x1e   : > { %p169_p11 = scmp.eq.s32.totalorder %s42_s18, 0  ;;  %p45_p12 = scmp.eq.s32.totalorder %s44_s19, 0 }
  0x1f   : > { %p1189_p13 = por %p162_p10, %p60_p5  ;;  %s171_s8 = sadd.s32 1, %s1017_s23 }
  0x20   : > { %p181_p0 = scmp.ne.s32.totalorder %s1017_s23, %s1013_s22  ;;  %p187_p2 = scmp.ne.s32.totalorder %s1013_s22, %s1009_s21 }
  0x21   : > { %s1459_s20 = scalar_select %p1189_p13, 1, 0 }
  0x22   : > { %s1197_s10 = scalar_select %p45_p12, %s1029_s26, %s47_s12  }
  0x23   : > { %1460 = sst [smem:[#allocation21_spill]] %s1459_s20  ;;  %p1204_p1 = por %p181_p0, %p1171_p7 }
  0x24   : > { %1461 = sst [smem:[#allocation22_spill]] %s1197_s10  ;;  %p756_p4 = scmp.lt.s32.totalorder %s1049_s7, 12 }
  0x25   : > { %s1200_s24 = scalar_select %p169_p11, %s1017_s23, %s171_s8  }
  0x26   : > { %s1463_s11 = scalar_select %p1204_p1, 1, 0 }
  0x27   : > { %1462 = sst [smem:[#allocation23_spill]] %s1200_s24  ;;  %p1211_p6 = por %p187_p2, %p162_p10 }
  0x28   : > { %s240_s13 = sand.u32 1, %s1029_s26   ;;  %s736_s19 = smul.u32 48, %s1045_s30 }
  0x29   : > { %s1464_s9 = scalar_select %p1211_p6, 1, 0 }
  0x2a   : > { %s691_s18 = sshll.u32 %s240_s13, 7  ;;  %p1219_p5 = pnand %p756_p4, %p1165_p3 }
  0x2b   : > { %s244_s20 = scalar_lea.vmem [#allocation4], %s691_s18  ;;  %s249_s15 = sadd.s32 %s1041_s29, %s736_s19 }
  0x2c   : > { %s252_s5 = sshll.u32 %s244_s20, 4  ;;  %s692_s8 = sshll.u32 %s249_s15, 7  ;;  %s1224_s5 = int_to_ptr.vmem [resolvable:$true] %s252_s5 }
  0x2d   : > { %s1466_s0 = sld [smem:[#allocation24_spill]]  ;;  %s1231_s14 = scalar_lea.sflag [#allocation5], %s240_s13 }
  0x2e   : > { %p867_p7 = pneg %p1219_p5 }
  0x33   : > { %s1229_s23 = scalar_lea.hbm %s1466_s0, %s692_s8  ;;  %s870_s24 = scalar_lea.hbm %s1466_s0, 24576 }
  0x34   : > { %s865_s20 = scalar_lea.hbm %s1229_s23, 2048  ;;  %p871_p12 = scmp.lt.u32.totalorder %s1229_s23, %s1466_s0 }
  0x35   : > { %p866_p3 = scmp.ne.s32.totalorder %s1229_s23, %s865_s20  ;;  %p872_p0 = scmp.lt.u32.totalorder %s870_s24, %s865_s20 }
  0x36   : > { %p874_p4 = scmp.lt.u32.totalorder %s865_s20, %s1229_s23 }
  0x37   : > { %p868_p10 = pnand %p867_p7, %p866_p3  ;;  %p873_p2 = por %p872_p0, %p871_p12 }
  0x39   : > { %p869_p11 = pneg %p868_p10  ;;  %p875_p6 = por %p874_p4, %p873_p2 }
  0x3b   : > { %p876_p13 = pnand %p875_p6, %p869_p11 }
  0x3d   : > { %879 = shalt.err (!%p876_p13)
}
  0x3e   : > { %s880_s13 = scalar_lea.vmem %s1224_s5, 2048  ;;  %s1051_s8 = smov [#allocation4]  }
  0x3f   : > { %p881_p3 = scmp.ne.s32.totalorder %s1224_s5, %s880_s13  ;;  %s885_s18 = sshll.u32 %s1051_s8, 4  ;;  %s886_s18 = int_to_ptr.vmem [resolvable:$false] %s885_s18 }
  0x40   : > { %s887_s19 = scalar_lea.vmem %s886_s18, 4096  ;;  %p888_p9 = scmp.lt.s32.totalorder %s1224_s5, %s886_s18 }
  0x41   : > { %p883_p10 = pnand %p881_p3, %p867_p7  ;;  %p889_p12 = scmp.lt.s32.totalorder %s887_s19, %s880_s13 }
  0x43   : > { %p884_p1 = pneg %p883_p10  ;;  %p890_p0 = por %p889_p12, %p888_p9 }
  0x45   : > { %p891_p2 = pnand %p890_p0, %p884_p1 }
  0x47   : > { %894 = shalt.err (!%p891_p2)
}
  0x48   : > { %s1052_s20 = smov 384   ;;  %s1053_s24 = smov 128  }
  0x49   : > { %s1054_s10 = smov 8   ;;  %p693_p13 = scmp.ge.s32.totalorder %s1049_s7, 1 }
  0x4a   : > { %748 = dma.hbm_to_vmem [thread:$0]  (!%p1219_p5), %s1229_s23, 2048, %s1224_s5, %s1231_s14, %s1052_s20, %s1053_s24, %s1054_s10  }
  0x4b   : > { %p260_p6 = scmp.lt.s32.totalorder %s1049_s7, 13 }
  0x4d   : > { %p261_p7 = pnand %p693_p13, %p260_p6 }
  0x4e   : > { %s1262_s15 = sand.u32 (!%p261_p7), 1, %s1025_s25  }
  0x4f   : > { %264 = sbr.rel (%p261_p7) target bundleno = 724 (0x2d4), region = 32  ;;  %s694_s13 = sshll.u32 (!%p261_p7), %s1262_s15, 7 }
  0x50   : > { %s267_s8 = scalar_lea.sflag (!%p261_p7), [#allocation5], %s1262_s15  ;;  %s1266_s18 = scalar_lea.vmem (!%p261_p7), [#allocation4], %s694_s13 }
  0x56   : > { %996 = dma.done.wait (%p1177_p8), %s267_s8, 2048  }
  0x57   : > { %998 = vsyncadd (%p1177_p8), %s267_s8, 4294965248  ;;  %s695_s5 = sshll.u32 %s1262_s15, 3  ;;  %s307_s23 = sand.u32 1, %s1013_s22  }
  0x58   : > { %p315_p9 = scmp.lt.s32.totalorder %s1037_s28, 3  ;;  %p317_p1 = scmp.lt.s32.totalorder %s1033_s27, 2 }
  0x59   : > { %s1288_s26 = scalar_lea.vmem [#allocation7], %s695_s5  ;;  %s1292_s25 = scalar_lea.vmem [#allocation8], %s307_s23 }
  0x5a   : > { %s316_s12 = scalar_select %p315_p9, %s1037_s28, 3 }
  0x5b   : > { %s318_s14 = scalar_select %p317_p1, %s1033_s27, 2 }
  0x5c   : > { %s737_s19 = smul.u32 3, %s316_s12  ;;  %s697_s20 = sshll.u32 %s316_s12, 3 }
  0x5d   : > { %s1281_s16 = scalar_lea.vmem %s1432_s6, %s697_s20  ;;  %p698_p8 = scmp.ne.s32.totalorder %s1033_s27, 0 }
  0x5e   : > { %s320_s13 = sadd.s32 %s737_s19, %s318_s14  ;;  %vm332_vm0 = vcmask (!%p698_p8), 7168   ;;  %v1055_v0 = vmov (!%p698_p8), 0.0  }
  0x5f   : > { %s696_s8 = sshll.u32 %s320_s13, 3  ;;  %331 = sbr.rel (%p698_p8) target bundleno = 102 (0x66), region = 40  ;;  %333 = vst.msk [vmem:[#allocation2] sm:$0xff] (!%p698_p8), %vm332_vm0, %v1055_v0  ;;  %334 = vst.msk [vmem:[#allocation3] sm:$0xff] (!%p698_p8), %vm332_vm0, %v1055_v0 }
  0x60   : > { %s1286_s29 = scalar_lea.vmem %s1429_s3, %s696_s8 }
  0x66 PF: > { %v335_v1 = vld [vmem:[%s1266_s18] sm:$0xff]  ;;  %v336_v2 = vld [vmem:[%s1266_s18 + $0x8] sm:$0xff]  ;;  %v337_v3 = vld [vmem:[%s1266_s18 + $0x10] sm:$0xff]  ;;  %v1056_v4 = vmov 0.0   ;;  %vm1057_vm1 = vmmov 0   ;;  %v1058_v7 = vmov 0  }
  0x67   : > { %716 = vmatprep.subr.bf16.mxu0 %v1056_v4  ;;  %v351_v5 = vpack.c.bf16 %v336_v2, %v335_v1  ;;  %v338_v6 = vld [vmem:[%s1266_s18 + $0x18] sm:$0xff]  ;;  %732 = vmatprep.mubr.msk.bf16.mxu0 %vm1057_vm1, %v1056_v4  ;;  %v339_v9 = vld [vmem:[%s1266_s18 + $0x20] sm:$0xff]  ;;  %v340_v10 = vld [vmem:[%s1266_s18 + $0x28] sm:$0xff]  ;;  %vm429_vm2 = vcmask 7168   ;;  %p701_p5 = scmp.ne.s32.totalorder %s1033_s27, 2 }
  0x68   : > { %854 = vset.pattern.permute.xlu0 %v1058_v7  ;;  %v352_v8 = vpack.c.bf16 %v338_v6, %v337_v3  ;;  %v361_v11 = vld [vmem:[%s1428_s2] sm:$0xff]  ;;  %v353_v12 = vpack.c.bf16 %v340_v10, %v339_v9  ;;  %v342_v14 = vld [vmem:[%s1266_s18 + $0x38] sm:$0xff]  ;;  %v343_v17 = vld [vmem:[%s1266_s18 + $0x40] sm:$0xff]  ;;  %v1059_v50 = vmov (!%p701_p5), 0   ;;  %v454_v57 = vlaneseq (!%p701_p5) }
  0x69   : > { %717 = vmatpush3.bf16.msra.mxu0 %v351_v5  ;;  %365 = vperm.xlu0 %854, %v361_v11   ;;  %v341_v13 = vld [vmem:[%s1266_s18 + $0x30] sm:$0xff]  ;;  %v362_v15 = vld [vmem:[%s1428_s2 + $0x8] sm:$0xff]  ;;  %v344_v18 = vld [vmem:[%s1266_s18 + $0x48] sm:$0xff]  ;;  %vm461_vm3 = vcmask (!%p701_p5), 57344  }
  0x6a   : > { %718 = vmatprep.subr.bf16.mxu0 %v1056_v4  ;;  %v354_v16 = vpack.c.bf16 %v342_v14, %v341_v13  ;;  %v355_v19 = vpack.c.bf16 %v344_v18, %v343_v17  ;;  %v345_v20 = vld [vmem:[%s1266_s18 + $0x50] sm:$0xff]  ;;  %v346_v21 = vld [vmem:[%s1266_s18 + $0x58] sm:$0xff]  ;;  %v347_v23 = vld [vmem:[%s1266_s18 + $0x60] sm:$0xff]  ;;  %v455_v58 = vand.u32 (!%p701_p5), 127, %v454_v57  ;;  %v457_v59 = vshrl.u32 (!%p701_p5), %v454_v57, 7 }
  0x6b   : > { %v356_v22 = vpack.c.bf16 %v346_v21, %v345_v20  ;;  %v348_v24 = vld [vmem:[%s1266_s18 + $0x68] sm:$0xff]  ;;  %v349_v26 = vld [vmem:[%s1266_s18 + $0x70] sm:$0xff]  ;;  %v350_v27 = vld [vmem:[%s1266_s18 + $0x78] sm:$0xff] }
  0x6c   : > { %v357_v25 = vpack.c.bf16 %v348_v24, %v347_v23  ;;  %v358_v28 = vpack.c.bf16 %v350_v27, %v349_v26  ;;  %v855_v29 = vld [vmem:[%s1427_s1] sm:$0xff]   ;;  %v431_v46 = vld [vmem:[#allocation3] sm:$0xff]  ;;  %v458_v60 = vsub.s32 (!%p701_p5), %v455_v58, %v457_v59 }
  0x6d   : > { %719 = vmatpush3.bf16.msra.mxu0 %v352_v8  ;;  %370 = vperm.xlu0 %854, %v362_v15   ;;  %v427_v43 = vld [vmem:[#allocation2] sm:$0xff] }
  0x6e   : > { %720 = vmatprep.subr.bf16.mxu0 %v1056_v4 }
  0x71   : > { %721 = vmatpush3.bf16.msra.mxu0 %v353_v12  ;;  %860 = vset.pattern.permute.xlu0 (!%p701_p5), %v1059_v50 }
  0x72   : > { %722 = vmatprep.subr.bf16.mxu0 %v1056_v4 }
  0x75   : > { %723 = vmatpush3.bf16.msra.mxu0 %v354_v16 }
  0x76   : > { %724 = vmatprep.subr.bf16.mxu0 %v1056_v4 }
  0x79   : > { %725 = vmatpush3.bf16.msra.mxu0 %v355_v19 }
  0x7a   : > { %726 = vmatprep.subr.bf16.mxu0 %v1056_v4 }
  0x7d   : > { %727 = vmatpush3.bf16.msra.mxu0 %v356_v22 }
  0x7e   : > { %728 = vmatprep.subr.bf16.mxu0 %v1056_v4 }
  0x81   : > { %729 = vmatpush3.bf16.msra.mxu0 %v357_v25 }
  0x82   : > { %730 = vmatprep.subr.bf16.mxu0 %v1056_v4 }
  0x85   : > { %731 = vmatpush3.bf16.msra.mxu0 %v358_v28 }
  0x88   : > { %733 = vmatmul.mubr.bf16.vlgmr.msra.gmra.mrb[0].mxu0 %v855_v29 }
  0xe8   : > { %v366_v30 = vpop.permute.xlu0 %365 }
  0xec   : > { %v371_v34 = vpop.permute.xlu0 %370 }
 0x15b   : > { %v413_v31 = vpop.f32.mrb[0].mxu0 }
 0x15c   : > { %v414_v32 = vadd.f32 %v413_v31, %v366_v30  ;;  %v734_v33 = vpop.f32.mrb[1].mxu0 }
 0x15d   : > { %v416_v35 = vpop.f32.mrb[2].mxu0 }
 0x15e   : > { %856 = vtanh.f32 %v414_v32  ;;  %v417_v36 = vadd.f32 %v416_v35, %v371_v34  ;;  %v735_v37 = vpop.f32.mrb[3].mxu0 }
 0x160   : > { %421 = vst [vmem:[%s1288_s26] sm:$0xff] %v417_v36 }
 0x168   : > { %v857_v38 = vpop.eup %856 }
 0x169   : > { %437 = vst [vmem:[%s1286_s29] sm:$0xff] %v857_v38  ;;  %v700_v39 = vadd.f32 -1.0, %v857_v38 }
 0x16b   : > { %v423_v40 = vmul.f32 1.442695, %v700_v39 }
 0x16d   : > { %858 = vpow2.f32 %v423_v40 }
 0x177   : > { %v859_v41 = vpop.eup %858 }
 0x178   : > { %425 = vadd.xlane.f32.xlu1 %v859_v41  ;;  %v432_v42 = vmul.f32 %v859_v41, %v417_v36 }
 0x17c   : > { %433 = vadd.xlane.f32.xlu1 %v432_v42 }
 0x205   : > { %v426_v44 = vpop.xlane.xlu1 %425 }
 0x206   : > { %v428_v45 = vadd.f32 %v427_v43, %v426_v44  ;;  %441 = sbr.rel (%p701_p5) target bundleno = 672 (0x2a0), region = 44 }
 0x208   : > { %430 = vst.msk [vmem:[#allocation2] sm:$0xff] %vm429_vm2, %v428_v45 }
 0x209   : > { %v434_v47 = vpop.xlane.xlu1 %433 }
 0x20a   : > { %v435_v48 = vadd.f32 %v434_v47, %v431_v46 }
 0x20c   : > { %436 = vst.msk [vmem:[#allocation3] sm:$0xff] %vm429_vm2, %v435_v48 }
 0x20f   : > { %v442_v49 = vld [vmem:[#allocation2] sm:$0xff] }
 0x210   : > { %861 = vrcp.f32 %v442_v49 }
 0x211   : > { %863 = vlog2.f32 %v442_v49 }
 0x213   : > { %v447_v51 = vld [vmem:[#allocation3] sm:$0xff] }
 0x21a   : > { %v862_v52 = vpop.eup %861 }
 0x21b   : > { %v864_v53 = vpop.eup %863  ;;  %v449_v54 = vmul.f32 %v862_v52, %v447_v51 }
 0x21c   : > { %v444_v55 = vmul.f32 0.6931472, %v864_v53 }
 0x21d   : > { %452 = vperm.xlu0 %860, %v449_v54  }
 0x21e   : > { %v445_v56 = vadd.f32 1.0, %v444_v55 }
 0x220   : > { %446 = vst.msk [vmem:[%s1281_s16] sm:$0xff] %vm429_vm2, %v445_v56 }
 0x29c   : > { %v453_v61 = vpop.permute.xlu0 %452 }
 0x29d   : > { %v459_v62 = vrot.slane %v453_v61, %v458_v60 }
 0x29f   : > { %462 = vst.msk [vmem:[%s1292_s25] sm:$0x1] %vm461_vm3, %v459_v62 }
 0x2a0 PF: > { %s738_s29 = smul.u32 3, %s1037_s28  ;;  %s498_s18 = sshll.u32 %s1288_s26, 4  ;;  %s1331_s18 = int_to_ptr.vmem [resolvable:$true] %s498_s18 }
 0x2a1   : > { %s704_s10 = sshll.u32 %s1037_s28, 4  ;;  %s1467_s5 = sld [smem:[#allocation25_spill]] }
 0x2a2   : > { %s494_s20 = sadd.s32 %s1033_s27, %s738_s29  ;;  %s472_s14 = scalar_lea.sflag [#allocation6], %s1262_s15 }
 0x2a3   : > { %s703_s24 = sshll.u32 %s494_s20, 7  ;;  %s895_s26 = scalar_lea.vmem %s1331_s18, 128 }
 0x2a4   : > { %s1337_s8 = scalar_lea.hbm %s1430_s4, %s703_s24  ;;  %p896_p11 = scmp.ne.s32.totalorder %s1331_s18, %s895_s26 }
 0x2a5   : > { %p1468_p4 = scmp.ne.s32.totalorder %s1458_s17, 0  ;;  %s1060_s27 = smov [#allocation7]  }
 0x2a6   : > { %s899_s19 = sshll.u32 %s1060_s27, 4  ;;  %s900_s19 = int_to_ptr.vmem [resolvable:$false] %s899_s19 }
 0x2a7   : > { %s1342_s12 = scalar_lea.hbm %s1467_s5, %s704_s10  ;;  %p897_p3 = pnand %p896_p11, %p1468_p4 }
 0x2a8   : > { %s901_s28 = scalar_lea.vmem %s900_s19, 256  ;;  %p902_p12 = scmp.lt.s32.totalorder %s1331_s18, %s900_s19 }
 0x2a9   : > { %p898_p10 = pneg %p897_p3  ;;  %p903_p0 = scmp.lt.s32.totalorder %s901_s28, %s895_s26 }
 0x2ab   : > { %p904_p2 = por %p903_p0, %p902_p12 }
 0x2ad   : > { %p905_p13 = pnand %p904_p2, %p898_p10 }
 0x2af   : > { %908 = shalt.err (!%p905_p13)
}
 0x2b0   : > { %s909_s15 = scalar_lea.hbm %s1337_s8, 128  ;;  %s913_s24 = scalar_lea.hbm %s1430_s4, 1536 }
 0x2b1   : > { %p910_p6 = scmp.ne.s32.totalorder %s1337_s8, %s909_s15  ;;  %p914_p1 = scmp.lt.u32.totalorder %s1337_s8, %s1430_s4 }
 0x2b2   : > { %p915_p8 = scmp.lt.u32.totalorder %s913_s24, %s909_s15  ;;  %p917_p11 = scmp.lt.u32.totalorder %s909_s15, %s1337_s8 }
 0x2b3   : > { %p911_p7 = pnand %p910_p6, %p1468_p4 }
 0x2b4   : > { %p916_p5 = por %p915_p8, %p914_p1 }
 0x2b5   : > { %p912_p9 = pneg %p911_p7 }
 0x2b6   : > { %p918_p3 = por %p917_p11, %p916_p5 }
 0x2b8   : > { %p919_p10 = pnand %p918_p3, %p912_p9 }
 0x2ba   : > { %922 = shalt.err (!%p919_p10)
}
 0x2bb   : > { %741 = dma.vmem_to_hbm [thread:$0]  (%p1468_p4), %s1331_s18, 128, %s1337_s8, %s472_s14  }
 0x2bc   : > { %s511_s13 = sshll.u32 %s1292_s25, 4  ;;  %s477_s0 = scalar_lea.sflag [#allocation9], %s307_s23  ;;  %s512_s13 = int_to_ptr.vmem [resolvable:$true] %s511_s13 }
 0x2bd   : > { %s923_s30 = scalar_lea.vmem %s512_s13, 16  ;;  %p1469_p0 = scmp.ne.s32.totalorder %s1463_s11, 0 }
 0x2be   : > { %p924_p12 = scmp.ne.s32.totalorder %s512_s13, %s923_s30  ;;  %s1061_s26 = smov [#allocation8]  }
 0x2bf   : > { %s927_s27 = sshll.u32 %s1061_s26, 4  ;;  %s928_s27 = int_to_ptr.vmem [resolvable:$false] %s927_s27 }
 0x2c0   : > { %p925_p2 = pnand %p924_p12, %p1469_p0  ;;  %s929_s19 = scalar_lea.vmem %s928_s27, 32 }
 0x2c1   : > { %p930_p6 = scmp.lt.s32.totalorder %s512_s13, %s928_s27  ;;  %p931_p7 = scmp.lt.s32.totalorder %s929_s19, %s923_s30 }
 0x2c2   : > { %p926_p13 = pneg %p925_p2 }
 0x2c3   : > { %p932_p9 = por %p931_p7, %p930_p6 }
 0x2c5   : > { %p933_p1 = pnand %p932_p9, %p926_p13 }
 0x2c7   : > { %936 = shalt.err (!%p933_p1)
}
 0x2c8   : > { %s937_s25 = scalar_lea.hbm %s1342_s12, 16  ;;  %s941_s18 = scalar_lea.hbm %s1467_s5, 64 }
 0x2c9   : > { %p938_p4 = scmp.ne.s32.totalorder %s1342_s12, %s937_s25  ;;  %p942_p11 = scmp.lt.u32.totalorder %s1342_s12, %s1467_s5 }
 0x2ca   : > { %p943_p3 = scmp.lt.u32.totalorder %s941_s18, %s937_s25  ;;  %p945_p12 = scmp.lt.u32.totalorder %s937_s25, %s1342_s12 }
 0x2cb   : > { %p939_p8 = pnand %p938_p4, %p1469_p0 }
 0x2cc   : > { %p944_p10 = por %p943_p3, %p942_p11 }
 0x2cd   : > { %p940_p5 = pneg %p939_p8 }
 0x2ce   : > { %p946_p2 = por %p945_p12, %p944_p10 }
 0x2d0   : > { %p947_p13 = pnand %p946_p2, %p940_p5 }
 0x2d2   : > { %950 = shalt.err (!%p947_p13)
}
 0x2d3   : > { %742 = dma.vmem_to_hbm [thread:$0]  (%p1469_p0), %s512_s13, 16, %s1342_s12, %s477_s0  }
 0x2d4 PF: > { %s1470_s28 = sld [smem:[#allocation14_spill]]  ;;  %s1471_s15 = sld [smem:[#allocation21_spill]] }
 0x2d5   : > { %p757_p6 = scmp.ge.s32.totalorder %s1049_s7, 2 }
 0x2da   : > { %s537_s29 = sand.u32 1, %s1470_s28   ;;  %p1472_p7 = scmp.ne.s32.totalorder %s1471_s15, 0 }
 0x2db   : > { %s538_s20 = scalar_lea.sflag [#allocation6], %s537_s29 }
 0x2dc   : > { %p750_p9 = pnand %p757_p6, %p1472_p7 }
 0x2de   : > { %1000 = dma.done.wait (!%p750_p9), %s538_s20, 128  }
 0x2df   : > { %1002 = vsyncadd (!%p750_p9), %s538_s20, 4294967168  ;;  %s546_s24 = sand.u32 1, %s1009_s21   ;;  %p1473_p1 = scmp.ne.s32.totalorder %s1464_s9, 0 }
 0x2e0   : > { %s547_s10 = scalar_lea.sflag [#allocation9], %s546_s24 }
 0x2e1   : > { %p753_p4 = pnand %p757_p6, %p1473_p1 }
 0x2e3   : > { %1004 = dma.done.wait (!%p753_p4), %s547_s10, 16  }
 0x2e4   : > { %1006 = vsyncadd (!%p753_p4), %s547_s10, 4294967280  ;;  %s26_s7 = sadd.s32 1, %s1049_s7   ;;  %s1474_s11 = sld [smem:[#allocation13_spill]] }
 0x2e5   : > { %p23_p0 = scmp.ge.s32.totalorder %s26_s7, 14   ;;  %s1475_s23 = sld [smem:[#allocation23_spill]] }
 0x2e6   : > { %s1476_s24 = sld [smem:[#allocation15_spill]]  ;;  %s1477_s25 = sld [smem:[#allocation16_spill]] }
 0x2e7   : > { %s1478_s26 = sld [smem:[#allocation22_spill]]  ;;  %s1479_s27 = sld [smem:[#allocation17_spill]] }
 0x2e8   : > { %s1480_s28 = sld [smem:[#allocation18_spill]]  ;;  %s1481_s29 = sld [smem:[#allocation19_spill]] }
 0x2e9   : > { %s1482_s30 = sld [smem:[#allocation20_spill]]  ;;  %s1483_s21 = smov %s1013_s22 }
 0x2ea   : > { %s1484_s22 = smov %s1474_s11  ;;  %25 = sbr.rel (!%p23_p0) target bundleno = 14 (0xe), region = 126 }
 0x2f1   :  { %558 = vsyncpa [#allocation5], 1 }
 0x2f2   :  { %560 = vsyncpa [#allocation5 + $0x1], 1 }
 0x2f3   :  { %561 = vsyncpa [#allocation6], 1 }
 0x2f4   :  { %563 = vsyncpa [#allocation6 + $0x1], 1 }
 0x2f5   :  { %564 = vsyncpa [#allocation9], 1 }
 0x2f6   :  { %566 = vsyncpa [#allocation9 + $0x1], 1 }

</bundles_post_ra>
